<compile_context>
chip_gen: v7x
topology: tpu7x:2x2x1
jax: 0.10.0
libtpu: 0.0.40
codegen_flags: <defaults>
</compile_context>

<pallas_src>
import functools

import jax
import jax.numpy as jnp
from jax.experimental import pallas as pl
from jax.experimental.pallas import tpu as pltpu

LANE = 128


# ----------------------------- Pallas kernel --------------------------------

def _policy_kernel(adj_ref, x_ref, pool_ref,
                   w1t_ref, b1t_ref, w2t_ref, b2t_ref, wht_ref, bht_ref,
                   out_ref, *, tiles_per_step):
    """Processes `tiles_per_step` packed tiles per grid step.

    Each tile is a block-diagonal packing of up to G graphs with nodes on the
    LANE axis.  Transposed GCN forward per tile:
      h1^T    = relu(W1^T @ (x^T @ A_hat^T) + b1^T)
      feats^T = relu(W2^T @ (h1^T @ A_hat^T) + b2^T)
      heads   = [w_head^T ; w_val^T] @ feats^T           (fused MXU matmul)
      logits  = heads[0] + b_head                        (lane-dense row)
      values  = tanh(heads[1] @ pool + b_val)            (per-graph mean pool)
    """
    np_pad = adj_ref.shape[-1]
    g = pool_ref.shape[-1]

    # Weights are resident across the whole grid; load once per step.
    pool = pool_ref[...]
    w1t = w1t_ref[...]
    b1t = b1t_ref[...]
    w2t = w2t_ref[...]
    b2t = b2t_ref[...]
    wht = wht_ref[...]
    bht = bht_ref[...]

    for t in range(tiles_per_step):          # static unroll (tiles_per_step is tiny)
        adj_t = adj_ref[t]                   # (Np, Np)  A_hat^T (block-diag, zero padded)
        xt = x_ref[t]                        # (Din, Np) x^T     (zero padded)

        # --- extractor layer 1 ---
        m1 = jnp.dot(xt, adj_t, preferred_element_type=jnp.float32)          # (Din, Np)
        h1 = jnp.maximum(
            jnp.dot(w1t, m1, preferred_element_type=jnp.float32) + b1t, 0.0)  # (H, Np)

        # --- extractor layer 2 -> per-node features (transposed) ---
        m2 = jnp.dot(h1, adj_t, preferred_element_type=jnp.float32)          # (H, Np)
        ft = jnp.maximum(
            jnp.dot(w2t, m2, preferred_element_type=jnp.float32) + b2t, 0.0)  # (F, Np)

        # --- fused policy + value heads: one (2, F) @ (F, Np) MXU matmul ---
        heads = jnp.dot(wht, ft, preferred_element_type=jnp.float32)         # (2, Np)
        logits_row = heads[0:1, :] + bht[0:1, :]                              # (1, Np)

        # Per-graph mean pool of the value-head row via the pooling matrix
        # (zeros out padded lanes, 1/n_g inside each graph's segment).
        vals = jnp.tanh(
            jnp.dot(heads[1:2, :], pool, preferred_element_type=jnp.float32)
            + bht[1:2, :])                                                    # (1, G)
        if g < np_pad:
            vals_row = jnp.concatenate(
                [vals, jnp.zeros((1, np_pad - g), jnp.float32)], axis=-1)     # (1, Np)
        else:
            vals_row = vals

        # Single lane-dense store: row 0 = logits, row 1 = per-graph values.
        out_ref[t] = jnp.concatenate([logits_row, vals_row], axis=0)          # (2, Np)


# ------------------------------ core pallas_call -----------------------------

def _vmem_limit_bytes(tiles_per_step, np_pad, din, h, f, g):
    # double-buffered in/out blocks + resident weights/pool + f32 intermediates + slack
    block_in = tiles_per_step * (np_pad * np_pad + din * np_pad) * 4
    block_out = tiles_per_step * 2 * np_pad * 4
    weights = (h * din + h + f * h + f + 2 * f + 2 + np_pad * g) * 4
    interm = tiles_per_step * (din + h + f + 2 + 2) * np_pad * 4
    need = 2 * (block_in + block_out) + 2 * weights + interm + (4 << 20)
    try:
        cap = int(pltpu.get_tpu_info().vmem_capacity_bytes)
    except Exception:  # non-TPU / interpret fallback
        cap = 128 << 20
    return int(max(16 << 20, min(need, int(cap * 0.75))))


def _policy_pallas(adj_t, xt, pool, params, tiles_per_step):
    """adj_t: (T, Np, Np) f32 A_hat^T tiles; xt: (T, Din, Np); pool: (Np, G)."""
    ntiles, np_pad, _ = adj_t.shape
    din = xt.shape[1]
    g = pool.shape[1]

    # Transposed / fused weights (tiny; prepared XLA-side).
    w1t = params["w1"].T.astype(jnp.float32)                        # (H, Din)
    b1t = params["b1"].T.astype(jnp.float32)                        # (H, 1)
    w2t = params["w2"].T.astype(jnp.float32)                        # (F, H)
    b2t = params["b2"].T.astype(jnp.float32)                        # (F, 1)
    wht = jnp.concatenate([params["w_head"].T, params["w_val"].T],
                          axis=0).astype(jnp.float32)               # (2, F)
    bht = jnp.concatenate([params["b_head"], params["b_val"]],
                          axis=0).astype(jnp.float32)               # (2, 1)

    h = w1t.shape[0]
    f = w2t.shape[0]

    flops = 2 * ntiles * (din * np_pad * np_pad + h * din * np_pad
                          + h * np_pad * np_pad + f * h * np_pad
                          + 2 * f * np_pad + np_pad * g)
    bytes_accessed = int(4 * (adj_t.size + xt.size + ntiles * 2 * np_pad
                              + w1t.size + b1t.size + w2t.size + b2t.size
                              + wht.size + bht.size + pool.size))

    kernel = functools.partial(_policy_kernel, tiles_per_step=tiles_per_step)

    out = pl.pallas_call(
        kernel,
        out_shape=jax.ShapeDtypeStruct((ntiles, 2, np_pad), jnp.float32),
        grid_spec=pltpu.PrefetchScalarGridSpec(
            num_scalar_prefetch=0,
            grid=(ntiles // tiles_per_step,),
            in_specs=[
                pl.BlockSpec((tiles_per_step, np_pad, np_pad), lambda i: (i, 0, 0)),
                pl.BlockSpec((tiles_per_step, din, np_pad), lambda i: (i, 0, 0)),
                pl.BlockSpec(pool.shape, lambda i: (0, 0)),
                pl.BlockSpec(w1t.shape, lambda i: (0, 0)),
                pl.BlockSpec(b1t.shape, lambda i: (0, 0)),
                pl.BlockSpec(w2t.shape, lambda i: (0, 0)),
                pl.BlockSpec(b2t.shape, lambda i: (0, 0)),
                pl.BlockSpec(wht.shape, lambda i: (0, 0)),
                pl.BlockSpec(bht.shape, lambda i: (0, 0)),
            ],
            out_specs=pl.BlockSpec((tiles_per_step, 2, np_pad), lambda i: (i, 0, 0)),
        ),
        compiler_params=pltpu.CompilerParams(
            dimension_semantics=("parallel",),
            vmem_limit_bytes=_vmem_limit_bytes(tiles_per_step, np_pad, din, h, f, g)),
        cost_estimate=pl.CostEstimate(flops=flops, transcendentals=ntiles * g,
                                      bytes_accessed=bytes_accessed),
    )(adj_t, xt, pool, w1t, b1t, w2t, b2t, wht, bht)
    return out   # (T, 2, Np): row 0 = packed logits, row 1 lanes 0..G-1 = values


# ------------------------------ JAX wrappers ----------------------------------

def _gcn_normalized_adj(edge_index, num_nodes):
    """Dense symmetric-normalized adjacency with self loops: D^-1/2 (A+I) D^-1/2.

    Scatter-free build (one-hot matmul + clamp) — vmapped scatters lower poorly
    on TPU.
    """
    src, dst = edge_index[0], edge_index[1]
    oh_src = jax.nn.one_hot(src, num_nodes, dtype=jnp.float32)   # (E, N)
    oh_dst = jax.nn.one_hot(dst, num_nodes, dtype=jnp.float32)   # (E, N)
    a = jnp.minimum(jnp.dot(oh_dst.T, oh_src), 1.0)              # message flows src -> dst
    a = jnp.maximum(a, jnp.eye(num_nodes, dtype=jnp.float32))
    deg = jnp.sum(a, axis=1)
    d_inv_sqrt = jax.lax.rsqrt(jnp.maximum(deg, 1e-12))
    return d_inv_sqrt[:, None] * a * d_inv_sqrt[None, :]


def _block_diag(adj_gnn):
    """(G, N, N) per-graph adjacencies -> (G*N, G*N) block-diagonal tile."""
    g, n, _ = adj_gnn.shape
    eye_g = jnp.eye(g, dtype=adj_gnn.dtype)
    return jnp.einsum("gij,gh->gihj", adj_gnn, eye_g).reshape(g * n, g * n)


def _lane_pad(n):
    return max(LANE, ((n + LANE - 1) // LANE) * LANE)


def _forward_packed(x_b, edge_index_b, params):
    """x_b: (B, N, Din), edge_index_b: (B, 2, E) -> (logits (B, N), values (B,))."""
    b, n, din = x_b.shape

    # --- packing geometry (all static) ---
    gpt = min(max(1, LANE // n), b) if n <= LANE else 1   # graphs per tile
    packed_nodes = gpt * n
    np_pad = _lane_pad(packed_nodes)
    ntiles = -(-b // gpt)
    tiles_per_step = 1 if ntiles == 1 else 2
    ntiles_pad = -(-ntiles // tiles_per_step) * tiles_per_step
    b_pad = ntiles_pad * gpt

    # --- pad the batch with dummy graphs (isolated by the block-diag layout) ---
    x_p = jnp.pad(x_b.astype(jnp.float32), ((0, b_pad - b), (0, 0), (0, 0)))
    ei_p = jnp.pad(edge_index_b, ((0, b_pad - b), (0, 0), (0, 0)))

    # --- per-graph normalized adjacency -> block-diagonal packed tiles ---
    adj = jax.vmap(lambda ei: _gcn_normalized_adj(ei, n))(ei_p)      # (b_pad, N, N)
    adj = adj.reshape(ntiles_pad, gpt, n, n)
    adj_bd = jax.vmap(_block_diag)(adj)                              # (T, G*N, G*N)
    adj_t = jnp.transpose(adj_bd, (0, 2, 1))                         # kernel wants A_hat^T
    adj_t = jnp.pad(adj_t, ((0, 0), (0, np_pad - packed_nodes),
                            (0, np_pad - packed_nodes)))

    # --- x^T packed side-by-side on the lane axis ---
    xt = jnp.transpose(x_p.reshape(ntiles_pad, packed_nodes, din), (0, 2, 1))
    xt = jnp.pad(xt, ((0, 0), (0, 0), (0, np_pad - packed_nodes)))   # (T, Din, Np)

    # --- per-graph mean-pool matrix (zeros padded lanes, 1/n inside segments) ---
    lane = jnp.arange(np_pad)
    gidx = jnp.arange(gpt)
    pool = jnp.where((lane[:, None] >= gidx[None, :] * n)
                     & (lane[:, None] < (gidx[None, :] + 1) * n),
                     1.0 / n, 0.0).astype(jnp.float32)               # (Np, G)

    out = _policy_pallas(adj_t, xt, pool, params, tiles_per_step)    # (T, 2, Np)

    logits = out[:, 0, :packed_nodes].reshape(ntiles_pad * gpt, n)[:b]
    values = out[:, 1, :gpt].reshape(ntiles_pad * gpt)[:b]
    return logits, values


@jax.jit
def policy_forward(x, edge_index, params, edge_attr=None):
    """Single graph (batch=None): returns (logits (N,), value (1,))."""
    del edge_attr  # TODO(synk): unused, see header comment.
    logits_b, values_b = _forward_packed(x[None], edge_index[None], params)
    return logits_b[0], values_b


@jax.jit
def policy_forward_batched(x_b, edge_index_b, params):
    """x_b: (B, N, Din), edge_index_b: (B, 2, E) -> (logits (B, N), values (B,))."""
    return _forward_packed(x_b, edge_index_b, params)


def init_params(key, in_dim, hidden_dim, features_dim):
    ks = jax.random.split(key, 6)

    def glorot(k, shape):
        fan_in, fan_out = shape
        lim = jnp.sqrt(6.0 / (fan_in + fan_out))
        return jax.random.uniform(k, shape, jnp.float32, -lim, lim)

    return {
        "w1": glorot(ks[0], (in_dim, hidden_dim)),
        "b1": jax.random.normal(ks[1], (1, hidden_dim), jnp.float32) * 0.01,
        "w2": glorot(ks[2], (hidden_dim, features_dim)),
        "b2": jax.random.normal(ks[3], (1, features_dim), jnp.float32) * 0.01,
        "w_head": glorot(ks[4], (features_dim, 1)),
        "b_head": jnp.zeros((1, 1), jnp.float32),
        "w_val": glorot(ks[5], (features_dim, 1)),
        "b_val": jnp.zeros((1, 1), jnp.float32),
    }


# ------------------------------ pure-JAX reference ----------------------------

def _reference_forward(x, edge_index, params):
    n = x.shape[0]
    a = _gcn_normalized_adj(edge_index, n)
    h1 = jnp.maximum(a @ x @ params["w1"] + params["b1"], 0.0)
    ft = jnp.maximum(a @ h1 @ params["w2"] + params["b2"], 0.0)
    logits = (ft @ params["w_head"] + params["b_head"]).reshape(-1)
    value = jnp.tanh(ft.mean(axis=0, keepdims=True) @ params["w_val"]
                     + params["b_val"]).reshape(-1)
    return logits, value


if __name__ == "__main__":
    N_NODES = 16       # nodes per graph
    IN_DIM = 8         # node feature dim
    HIDDEN = 32        # extractor hidden dim
    FEATURES_DIM = 32  # features_extractor.features_dim
    N_EDGES = 24

    key = jax.random.PRNGKey(0)
    k_x, k_e, k_p, k_xb, k_eb = jax.random.split(key, 5)

    x = jax.random.normal(k_x, (N_NODES, IN_DIM), jnp.float32)
    edge_index = jax.random.randint(k_e, (2, N_EDGES), 0, N_NODES, jnp.int32)
    params = init_params(k_p, IN_DIM, HIDDEN, FEATURES_DIM)

    # --- single-graph forward (matches Policy.forward with batch=None) ---
    logits, value = policy_forward(x, edge_index, params)
    jax.block_until_ready((logits, value))
    assert logits.shape == (N_NODES,)
    assert value.shape == (1,)
    ref_l, ref_v = _reference_forward(x, edge_index, params)
    assert bool(jnp.allclose(logits, ref_l, rtol=2e-2, atol=2e-2))
    assert bool(jnp.allclose(value, ref_v, rtol=2e-2, atol=2e-2))

    # --- batched forward: 4 graphs pack into a single 128-lane tile ---
    B = 4
    x_b = jax.random.normal(k_xb, (B, N_NODES, IN_DIM), jnp.float32)
    ei_b = jax.random.randint(k_eb, (B, 2, N_EDGES), 0, N_NODES, jnp.int32)
    logits_b, values_b = policy_forward_batched(x_b, ei_b, params)
    jax.block_until_ready((logits_b, values_b))
    assert logits_b.shape == (B, N_NODES)
    assert values_b.shape == (B,)
    ref_lb, ref_vb = jax.vmap(
        lambda xx, ee: _reference_forward(xx, ee, params))(x_b, ei_b)
    assert bool(jnp.allclose(logits_b, ref_lb, rtol=2e-2, atol=2e-2))
    assert bool(jnp.allclose(values_b, ref_vb.reshape(-1), rtol=2e-2, atol=2e-2))

    # --- larger batch: 8 graphs/tile, multiple tiles per grid step (grid > 1) ---
    B2 = 20
    k_xb2, k_eb2 = jax.random.split(jax.random.PRNGKey(1), 2)
    x_b2 = jax.random.normal(k_xb2, (B2, N_NODES, IN_DIM), jnp.float32)
    ei_b2 = jax.random.randint(k_eb2, (B2, 2, N_EDGES), 0, N_NODES, jnp.int32)
    logits_b2, values_b2 = policy_forward_batched(x_b2, ei_b2, params)
    jax.block_until_ready((logits_b2, values_b2))
    assert logits_b2.shape == (B2, N_NODES)
    assert values_b2.shape == (B2,)
    ref_lb2, ref_vb2 = jax.vmap(
        lambda xx, ee: _reference_forward(xx, ee, params))(x_b2, ei_b2)
    assert bool(jnp.allclose(logits_b2, ref_lb2, rtol=2e-2, atol=2e-2))
    assert bool(jnp.allclose(values_b2, ref_vb2.reshape(-1), rtol=2e-2, atol=2e-2))

    print("KERNEL_OK")
</pallas_src>

<mosaic_0001>
module attributes {stable_mosaic.version = 11 : i64} {
  func.func @_policy_kernel(%arg0: i32, %arg1: memref<1x128x128xf32, #tpu.memory_space<vmem>>, %arg2: memref<1x8x128xf32, #tpu.memory_space<vmem>>, %arg3: memref<128x1xf32, #tpu.memory_space<vmem>>, %arg4: memref<32x8xf32, #tpu.memory_space<vmem>>, %arg5: memref<32x1xf32, #tpu.memory_space<vmem>>, %arg6: memref<32x32xf32, #tpu.memory_space<vmem>>, %arg7: memref<32x1xf32, #tpu.memory_space<vmem>>, %arg8: memref<2x32xf32, #tpu.memory_space<vmem>>, %arg9: memref<2x1xf32, #tpu.memory_space<vmem>>, %arg10: memref<1x2x128xf32, #tpu.memory_space<vmem>>) attributes {dimension_semantics = [#tpu.dimension_semantics<parallel>], iteration_bounds = array<i64: 1>, scalar_prefetch = 0 : i64, scratch_operands = 0 : i64, tpu.core_type = #tpu.core_type<tc>, window_params = [{transform_indices = @transform_0, window_bounds = array<i64: 1, 128, 128>}, {transform_indices = @transform_1, window_bounds = array<i64: 1, 8, 128>}, {pipeline_mode = #tpu.pipeline_mode<synchronous>, transform_indices = @transform_2, window_bounds = array<i64: 128, 1>}, {pipeline_mode = #tpu.pipeline_mode<synchronous>, transform_indices = @transform_3, window_bounds = array<i64: 32, 8>}, {pipeline_mode = #tpu.pipeline_mode<synchronous>, transform_indices = @transform_4, window_bounds = array<i64: 32, 1>}, {pipeline_mode = #tpu.pipeline_mode<synchronous>, transform_indices = @transform_5, window_bounds = array<i64: 32, 32>}, {pipeline_mode = #tpu.pipeline_mode<synchronous>, transform_indices = @transform_6, window_bounds = array<i64: 32, 1>}, {pipeline_mode = #tpu.pipeline_mode<synchronous>, transform_indices = @transform_7, window_bounds = array<i64: 2, 32>}, {pipeline_mode = #tpu.pipeline_mode<synchronous>, transform_indices = @transform_8, window_bounds = array<i64: 2, 1>}, {transform_indices = @transform_9, window_bounds = array<i64: 1, 2, 128>}]} {
    %c0 = arith.constant 0 : index
    %c0_0 = arith.constant 0 : index
    %0 = vector.load %arg3[%c0, %c0_0] : memref<128x1xf32, #tpu.memory_space<vmem>>, vector<128x1xf32>
    %c0_1 = arith.constant 0 : index
    %c0_2 = arith.constant 0 : index
    %1 = vector.load %arg4[%c0_1, %c0_2] : memref<32x8xf32, #tpu.memory_space<vmem>>, vector<32x8xf32>
    %c0_3 = arith.constant 0 : index
    %c0_4 = arith.constant 0 : index
    %2 = vector.load %arg5[%c0_3, %c0_4] : memref<32x1xf32, #tpu.memory_space<vmem>>, vector<32x1xf32>
    %c0_5 = arith.constant 0 : index
    %c0_6 = arith.constant 0 : index
    %3 = vector.load %arg6[%c0_5, %c0_6] : memref<32x32xf32, #tpu.memory_space<vmem>>, vector<32x32xf32>
    %c0_7 = arith.constant 0 : index
    %c0_8 = arith.constant 0 : index
    %4 = vector.load %arg7[%c0_7, %c0_8] : memref<32x1xf32, #tpu.memory_space<vmem>>, vector<32x1xf32>
    %c0_9 = arith.constant 0 : index
    %c0_10 = arith.constant 0 : index
    %5 = vector.load %arg8[%c0_9, %c0_10] : memref<2x32xf32, #tpu.memory_space<vmem>>, vector<2x32xf32>
    %c0_11 = arith.constant 0 : index
    %c0_12 = arith.constant 0 : index
    %6 = vector.load %arg9[%c0_11, %c0_12] : memref<2x1xf32, #tpu.memory_space<vmem>>, vector<2x1xf32>
    %c0_13 = arith.constant 0 : index
    %c0_14 = arith.constant 0 : index
    %c0_15 = arith.constant 0 : index
    %7 = vector.load %arg1[%c0_13, %c0_14, %c0_15] : memref<1x128x128xf32, #tpu.memory_space<vmem>>, vector<1x128x128xf32>
    %8 = vector.shape_cast %7 : vector<1x128x128xf32> to vector<128x128xf32>
    %c0_16 = arith.constant 0 : index
    %c0_17 = arith.constant 0 : index
    %c0_18 = arith.constant 0 : index
    %9 = vector.load %arg2[%c0_16, %c0_17, %c0_18] : memref<1x8x128xf32, #tpu.memory_space<vmem>>, vector<1x8x128xf32>
    %10 = vector.shape_cast %9 : vector<1x8x128xf32> to vector<8x128xf32>
    %cst = arith.constant dense<0.000000e+00> : vector<8x128xf32>
    %11 = tpu.matmul %10, %8, %cst {dimension_numbers = #tpu.dot_dimension_numbers<[1], [0], [0], [1], [0, 0, 1, 1], [], []>} : vector<8x128xf32>, vector<128x128xf32>, vector<8x128xf32> -> vector<8x128xf32>
    %cst_19 = arith.constant dense<0.000000e+00> : vector<32x128xf32>
    %12 = tpu.matmul %1, %11, %cst_19 {dimension_numbers = #tpu.dot_dimension_numbers<[1], [0], [0], [1], [0, 0, 1, 1], [], []>} : vector<32x8xf32>, vector<8x128xf32>, vector<32x128xf32> -> vector<32x128xf32>
    %13 = vector.broadcast %2 : vector<32x1xf32> to vector<32x128xf32>
    %14 = arith.addf %12, %13 : vector<32x128xf32>
    %cst_20 = arith.constant 0.000000e+00 : f32
    %15 = vector.broadcast %cst_20 : f32 to vector<32x128xf32>
    %16 = arith.maximumf %14, %15 : vector<32x128xf32>
    %cst_21 = arith.constant dense<0.000000e+00> : vector<32x128xf32>
    %17 = tpu.matmul %16, %8, %cst_21 {dimension_numbers = #tpu.dot_dimension_numbers<[1], [0], [0], [1], [0, 0, 1, 1], [], []>} : vector<32x128xf32>, vector<128x128xf32>, vector<32x128xf32> -> vector<32x128xf32>
    %cst_22 = arith.constant dense<0.000000e+00> : vector<32x128xf32>
    %18 = tpu.matmul %3, %17, %cst_22 {dimension_numbers = #tpu.dot_dimension_numbers<[1], [0], [0], [1], [0, 0, 1, 1], [], []>} : vector<32x32xf32>, vector<32x128xf32>, vector<32x128xf32> -> vector<32x128xf32>
    %19 = vector.broadcast %4 : vector<32x1xf32> to vector<32x128xf32>
    %20 = arith.addf %18, %19 : vector<32x128xf32>
    %cst_23 = arith.constant 0.000000e+00 : f32
    %21 = vector.broadcast %cst_23 : f32 to vector<32x128xf32>
    %22 = arith.maximumf %20, %21 : vector<32x128xf32>
    %cst_24 = arith.constant dense<0.000000e+00> : vector<2x128xf32>
    %23 = tpu.matmul %5, %22, %cst_24 {dimension_numbers = #tpu.dot_dimension_numbers<[1], [0], [0], [1], [0, 0, 1, 1], [], []>} : vector<2x32xf32>, vector<32x128xf32>, vector<2x128xf32> -> vector<2x128xf32>
    %24 = vector.extract_strided_slice %23 {offsets = [0, 0], sizes = [1, 128], strides = [1, 1]} : vector<2x128xf32> to vector<1x128xf32>
    %25 = vector.extract_strided_slice %6 {offsets = [0, 0], sizes = [1, 1], strides = [1, 1]} : vector<2x1xf32> to vector<1x1xf32>
    %26 = vector.broadcast %25 : vector<1x1xf32> to vector<1x128xf32>
    %27 = arith.addf %24, %26 : vector<1x128xf32>
    %28 = vector.extract_strided_slice %23 {offsets = [1, 0], sizes = [1, 128], strides = [1, 1]} : vector<2x128xf32> to vector<1x128xf32>
    %cst_25 = arith.constant dense<0.000000e+00> : vector<1x1xf32>
    %29 = tpu.matmul %28, %0, %cst_25 {dimension_numbers = #tpu.dot_dimension_numbers<[1], [0], [0], [1], [0, 0, 1, 1], [], []>} : vector<1x128xf32>, vector<128x1xf32>, vector<1x1xf32> -> vector<1x1xf32>
    %30 = vector.extract_strided_slice %6 {offsets = [1, 0], sizes = [1, 1], strides = [1, 1]} : vector<2x1xf32> to vector<1x1xf32>
    %31 = arith.addf %29, %30 : vector<1x1xf32>
    %32 = math.tanh %31 : vector<1x1xf32>
    %cst_26 = arith.constant 0.000000e+00 : f32
    %33 = vector.broadcast %cst_26 : f32 to vector<1x127xf32>
    %34 = tpu.concatenate %32, %33 in 1 : vector<1x1xf32>, vector<1x127xf32> -> vector<1x128xf32>
    %35 = tpu.concatenate %27, %34 in 0 : vector<1x128xf32>, vector<1x128xf32> -> vector<2x128xf32>
    %c0_27 = arith.constant 0 : index
    %c0_28 = arith.constant 0 : index
    %c0_29 = arith.constant 0 : index
    %36 = vector.load %arg10[%c0_27, %c0_28, %c0_29] : memref<1x2x128xf32, #tpu.memory_space<vmem>>, vector<1x2x128xf32>
    %37 = vector.shape_cast %36 : vector<1x2x128xf32> to vector<2x128xf32>
    %38 = vector.shape_cast %35 : vector<2x128xf32> to vector<1x2x128xf32>
    tpu.vector_store %arg10[%c0_27, %c0_28, %c0_29], %38 {strides = array<i32>} : memref<1x2x128xf32, #tpu.memory_space<vmem>>, vector<1x2x128xf32>,
    return
  }
  func.func @transform_0(%arg0: i32) -> (i32, i32, i32) {
    %c0_i32 = arith.constant 0 : i32
    %c0_i32_0 = arith.constant 0 : i32
    %c0_i32_1 = arith.constant 0 : i32
    return %arg0, %c0_i32, %c0_i32_0 : i32, i32, i32
  }
  func.func @transform_1(%arg0: i32) -> (i32, i32, i32) {
    %c0_i32 = arith.constant 0 : i32
    %c0_i32_0 = arith.constant 0 : i32
    %c0_i32_1 = arith.constant 0 : i32
    return %arg0, %c0_i32, %c0_i32_0 : i32, i32, i32
  }
  func.func @transform_2(%arg0: i32) -> (i32, i32) {
    %c0_i32 = arith.constant 0 : i32
    %c0_i32_0 = arith.constant 0 : i32
    %c0_i32_1 = arith.constant 0 : i32
    return %c0_i32, %c0_i32_0 : i32, i32
  }
  func.func @transform_3(%arg0: i32) -> (i32, i32) {
    %c0_i32 = arith.constant 0 : i32
    %c0_i32_0 = arith.constant 0 : i32
    %c0_i32_1 = arith.constant 0 : i32
    return %c0_i32, %c0_i32_0 : i32, i32
  }
  func.func @transform_4(%arg0: i32) -> (i32, i32) {
    %c0_i32 = arith.constant 0 : i32
    %c0_i32_0 = arith.constant 0 : i32
    %c0_i32_1 = arith.constant 0 : i32
    return %c0_i32, %c0_i32_0 : i32, i32
  }
  func.func @transform_5(%arg0: i32) -> (i32, i32) {
    %c0_i32 = arith.constant 0 : i32
    %c0_i32_0 = arith.constant 0 : i32
    %c0_i32_1 = arith.constant 0 : i32
    return %c0_i32, %c0_i32_0 : i32, i32
  }
  func.func @transform_6(%arg0: i32) -> (i32, i32) {
    %c0_i32 = arith.constant 0 : i32
    %c0_i32_0 = arith.constant 0 : i32
    %c0_i32_1 = arith.constant 0 : i32
    return %c0_i32, %c0_i32_0 : i32, i32
  }
  func.func @transform_7(%arg0: i32) -> (i32, i32) {
    %c0_i32 = arith.constant 0 : i32
    %c0_i32_0 = arith.constant 0 : i32
    %c0_i32_1 = arith.constant 0 : i32
    return %c0_i32, %c0_i32_0 : i32, i32
  }
  func.func @transform_8(%arg0: i32) -> (i32, i32) {
    %c0_i32 = arith.constant 0 : i32
    %c0_i32_0 = arith.constant 0 : i32
    %c0_i32_1 = arith.constant 0 : i32
    return %c0_i32, %c0_i32_0 : i32, i32
  }
  func.func @transform_9(%arg0: i32) -> (i32, i32, i32) {
    %c0_i32 = arith.constant 0 : i32
    %c0_i32_0 = arith.constant 0 : i32
    %c0_i32_1 = arith.constant 0 : i32
    return %arg0, %c0_i32, %c0_i32_0 : i32, i32, i32
  }
}

</mosaic_0001>

<bundles_post_ra>
// kernel: policy_forward.1
= control target key start
LH: loop header
LB: loop body
LE: loop exit
PB: predicated region body
PF: predicated region fallthrough
CT: control target
= control target key end

     0   :  { %v973_v0 = vmov 0.0|0.0   ;;  %vm974_vm0 = vmmov 0   ;;  %v975_v4 = vmov 0.0   ;;  %vm173_vm1 = vcmask 64512   ;;  %s1255_s0 = inlined_call_operand.vmem [shape: f32[1,128,128], index: 0, kind: input, shape index: {}]   ;;  %s1256_s1 = inlined_call_operand.vmem [shape: f32[1,8,128], index: 1, kind: input, shape index: {}]   ;;  %s1257_s3 = inlined_call_operand.vmem [shape: f32[32,8], index: 3, kind: input, shape index: {}]   ;;  %s1258_s4 = inlined_call_operand.vmem [shape: f32[32,1], index: 4, kind: input, shape index: {}]   ;;  %s1259_s6 = inlined_call_operand.vmem [shape: f32[32,1], index: 6, kind: input, shape index: {}]   ;;  %s1260_s8 = inlined_call_operand.vmem [shape: f32[2,1], index: 8, kind: input, shape index: {}]   ;;  %s1261_s5 = inlined_call_operand.vmem [shape: f32[32,32], index: 5, kind: input, shape index: {}]   ;;  %s1262_s2 = inlined_call_operand.vmem [shape: f32[128,1], index: 2, kind: input, shape index: {}]   ;;  %s1263_s7 = inlined_call_operand.vmem [shape: f32[2,32], index: 7, kind: input, shape index: {}]   ;;  %s1264_s9 = inlined_call_operand.vmem [shape: f32[1,2,128], index: 9, kind: output, shape index: {}]  }
   0x1   :  { %871 = vmatprep.subr.bf16.mxu0 %v973_v0  ;;  %v66_v1 = vld [vmem:[%s1255_s0] sm:$0xff]  ;;  %v67_v2 = vld [vmem:[%s1255_s0 + $0x8] sm:$0xff]  ;;  %v68_v3 = vld [vmem:[%s1255_s0 + $0x10] sm:$0xff]  ;;  %762 = vmatprep.mubr.msk.f32.mxu0 %vm974_vm0, %v975_v4  ;;  %v976_v28 = vmov 0   ;;  %vm380_vm2 = vcmask 261120   ;;  %vm637_vm3 = vcmask 7168  }
   0x2   :  { %v1039_v5 = vpack.c.bf16 %v67_v2, %v66_v1  ;;  %v69_v6 = vld [vmem:[%s1255_s0 + $0x18] sm:$0xff]  ;;  %v70_v8 = vld [vmem:[%s1255_s0 + $0x20] sm:$0xff]  ;;  %v71_v9 = vld [vmem:[%s1255_s0 + $0x28] sm:$0xff]  ;;  %969 = vset.pattern.permute.xlu0 %v976_v28  ;;  %970 = vset.pattern.permute.xlu1 %v976_v28  ;;  %vm642_vm4 = vcmask 1040384  }
   0x3   :  { %v1045_v7 = vpack.c.bf16 %v69_v6, %v68_v3  ;;  %v1055_v10 = vpack.c.bf16 %v71_v9, %v70_v8  ;;  %v72_v11 = vld [vmem:[%s1255_s0 + $0x30] sm:$0xff]  ;;  %v73_v12 = vld [vmem:[%s1255_s0 + $0x38] sm:$0xff]  ;;  %v74_v14 = vld [vmem:[%s1255_s0 + $0x40] sm:$0xff] }
   0x4   :  { %873 = vmatpush3.bf16.msra.mxu0 %v1039_v5  ;;  %v1065_v13 = vpack.c.bf16 %v73_v12, %v72_v11  ;;  %v75_v15 = vld [vmem:[%s1255_s0 + $0x48] sm:$0xff]  ;;  %v76_v17 = vld [vmem:[%s1255_s0 + $0x50] sm:$0xff]  ;;  %v77_v18 = vld [vmem:[%s1255_s0 + $0x58] sm:$0xff] }
   0x5   :  { %874 = vmatprep.subr.bf16.mxu0 %v973_v0  ;;  %v1075_v16 = vpack.c.bf16 %v75_v15, %v74_v14  ;;  %v1085_v19 = vpack.c.bf16 %v77_v18, %v76_v17  ;;  %v78_v20 = vld [vmem:[%s1255_s0 + $0x60] sm:$0xff]  ;;  %v79_v21 = vld [vmem:[%s1255_s0 + $0x68] sm:$0xff]  ;;  %v80_v23 = vld [vmem:[%s1255_s0 + $0x70] sm:$0xff] }
   0x6   :  { %v1095_v22 = vpack.c.bf16 %v79_v21, %v78_v20  ;;  %v81_v24 = vld [vmem:[%s1255_s0 + $0x78] sm:$0xff]  ;;  %v82_v26 = vld [vmem:[%s1256_s1] sm:$0xff]  ;;  %v54_v30 = vld [vmem:[%s1258_s4 + $0x10] sm:$0xff] }
   0x7   :  { %v893_v25 = vpack.c.bf16 %v81_v24, %v80_v23  ;;  %v48_v27 = vld [vmem:[%s1257_s3] sm:$0xff]  ;;  %165 = vperm.xlu1 %970, %v54_v30   ;;  %v53_v31 = vld [vmem:[%s1258_s4 + $0x8] sm:$0xff]  ;;  %v55_v32 = vld [vmem:[%s1258_s4 + $0x18] sm:$0xff] }
   0x8   :  { %876 = vmatpush3.bf16.msra.mxu0 %v1045_v7  ;;  %767 = vmatprep.mubr.msk.f32.mxu1 %vm173_vm1, %v48_v27  ;;  %v52_v29 = vld [vmem:[%s1258_s4] sm:$0xff]  ;;  %v61_v34 = vld [vmem:[%s1259_s6 + $0x8] sm:$0xff]  ;;  %v62_v35 = vld [vmem:[%s1259_s6 + $0x10] sm:$0xff] }
   0x9   :  { %877 = vmatprep.subr.bf16.mxu0 %v973_v0  ;;  %155 = vperm.xlu0 %969, %v52_v29   ;;  %v60_v33 = vld [vmem:[%s1259_s6] sm:$0xff]  ;;  %v63_v36 = vld [vmem:[%s1259_s6 + $0x18] sm:$0xff]  ;;  %v49_v39 = vld [vmem:[%s1257_s3 + $0x8] sm:$0xff] }
   0xa   :  { %v1143_v37 = vld [vmem:[%s1260_s8] sm:$0x3]  ;;  %v50_v41 = vld [vmem:[%s1257_s3 + $0x10] sm:$0xff]  ;;  %v51_v42 = vld [vmem:[%s1257_s3 + $0x18] sm:$0xff] }
   0xb   :  { %170 = vperm.xlu1 %970, %v55_v32   ;;  %v56_v59 = vld [vmem:[%s1261_s5] sm:$0xff]  ;;  %v57_v3 = vld [vmem:[%s1261_s5 + $0x8] sm:$0xff]  ;;  %v59_v6 = vld [vmem:[%s1261_s5 + $0x18] sm:$0xff] }
   0xc   :  { %879 = vmatpush3.bf16.msra.mxu0 %v1055_v10  ;;  %v33_v8 = vld [vmem:[%s1262_s2 + $0x8] sm:$0xff]  ;;  %v34_v9 = vld [vmem:[%s1262_s2 + $0x10] sm:$0xff]  ;;  %v35_v11 = vld [vmem:[%s1262_s2 + $0x18] sm:$0xff] }
   0xd   :  { %880 = vmatprep.subr.bf16.mxu0 %v973_v0  ;;  %160 = vperm.xlu0 %969, %v53_v31   ;;  %v945_v12 = vpack.c.bf16 %v35_v11, %v34_v9  ;;  %v38_v15 = vld [vmem:[%s1262_s2 + $0x30] sm:$0xff]  ;;  %v40_v18 = vld [vmem:[%s1262_s2 + $0x40] sm:$0xff] }
   0xe   :  { %v42_v21 = vld [vmem:[%s1262_s2 + $0x50] sm:$0xff]  ;;  %v44_v24 = vld [vmem:[%s1262_s2 + $0x60] sm:$0xff] }
   0xf   :  { %367 = vperm.xlu1 %970, %v61_v34  }
  0x10   :  { %882 = vmatpush3.bf16.msra.mxu0 %v1065_v13 }
  0x11   :  { %883 = vmatprep.subr.bf16.mxu0 %v973_v0  ;;  %362 = vperm.xlu0 %969, %v60_v33  }
  0x13   :  { %377 = vperm.xlu1 %970, %v63_v36  }
  0x14   :  { %885 = vmatpush3.bf16.msra.mxu0 %v1075_v16 }
  0x15   :  { %886 = vmatprep.subr.bf16.mxu0 %v973_v0  ;;  %372 = vperm.xlu0 %969, %v62_v35  }
  0x18   :  { %888 = vmatpush3.bf16.msra.mxu0 %v1085_v19 }
  0x19   :  { %889 = vmatprep.subr.bf16.mxu0 %v973_v0  ;;  %557 = vperm.xlu0 %969, %v1143_v37  }
  0x1c   :  { %891 = vmatpush3.bf16.msra.mxu0 %v1095_v22 }
  0x1d   :  { %892 = vmatprep.subr.bf16.mxu0 %v973_v0 }
  0x20   :  { %894 = vmatpush3.bf16.msra.mxu0 %v893_v25 }
  0x21   :  { %941 = vmatprep.subr.bf16.mxu0 %v973_v0 }
  0x23   :  { %763 = vmatmul.mubr.f32.vlgmr.msra.gmra.mrb[0].mxu0 %v82_v26 }
  0x24   :  { %868 = vmatprep.mubr.msk.f32.mxu0 %vm974_vm0, %v975_v4 }
  0x86   :  { %v166_v44 = vpop.permute.xlu1 %165 }
  0x88   :  { %v156_v43 = vpop.permute.xlu0 %155 }
  0x8a   :  { %v171_v50 = vpop.permute.xlu1 %170 }
  0x8c   :  { %v161_v45 = vpop.permute.xlu0 %160 }
  0x8e   :  { %v368_v27 = vpop.permute.xlu1 %367 }
  0x90   :  { %v363_v28 = vpop.permute.xlu0 %362 }
  0x92   :  { %v378_v34 = vpop.permute.xlu1 %377 }
  0xf6   :  { %v149_v38 = vpop.f32.mrb[0].mxu0 }
  0xf7   :  { %v764_v40 = vpop.f32.mrb[1].mxu0  ;;  %765 = vmatprep.subr.mxu1 %v149_v38 }
  0xf8   :  { %766 = vmatpush3.msra.mxu1 %v149_v38  ;;  %v373_v38 = vpop.permute.xlu0 %372 }
  0xf9   :  { %768 = vmatmul.mubr.msk.f32.vlgmr.msra.gmra.mrb[0].mxu1 %vm173_vm1, %v49_v39  ;;  %896 = vmatprep.subr.bf16.mxu1 %v1039_v5 }
  0xfa   :  { %770 = vmatprep.mubr.msk.f32.mxu1 %vm173_vm1, %v50_v41  ;;  %898 = vmatpush3.bf16.msra.mxu1 %v1039_v5  ;;  %v58_v5 = vld [vmem:[%s1261_s5 + $0x10] sm:$0xff] }
  0xfb   :  { %900 = vmatprep.subr.bf16.mxu1 %v1045_v7 }
  0xfd   :  { %771 = vmatmul.mubr.msk.f32.gmra.mrb[2].mxu1 %vm173_vm1, %v51_v42 }
  0xfe   :  { %902 = vmatpush3.bf16.msra.mxu1 %v1045_v7  ;;  %v32_v7 = vld [vmem:[%s1262_s2] sm:$0xff] }
  0xff   :  { %904 = vmatprep.subr.bf16.mxu1 %v1055_v10 }
 0x102   :  { %906 = vmatpush3.bf16.msra.mxu1 %v1055_v10  ;;  %v942_v10 = vpack.c.bf16 %v33_v8, %v32_v7 }
 0x103   :  { %908 = vmatprep.subr.bf16.mxu1 %v1065_v13 }
 0x104   :  { %943 = vmatpush3.bf16.msra.mxu0 %v942_v10 }
 0x105   :  { %944 = vmatprep.subr.bf16.mxu0 %v973_v0 }
 0x106   :  { %910 = vmatpush3.bf16.msra.mxu1 %v1065_v13  ;;  %v37_v13 = vld [vmem:[%s1262_s2 + $0x28] sm:$0xff] }
 0x107   :  { %912 = vmatprep.subr.bf16.mxu1 %v1075_v16 }
 0x108   :  { %946 = vmatpush3.bf16.msra.mxu0 %v945_v12 }
 0x109   :  { %947 = vmatprep.subr.bf16.mxu0 %v973_v0 }
 0x10a   :  { %914 = vmatpush3.bf16.msra.mxu1 %v1075_v16  ;;  %v39_v16 = vld [vmem:[%s1262_s2 + $0x38] sm:$0xff] }
 0x10b   :  { %916 = vmatprep.subr.bf16.mxu1 %v1085_v19  ;;  %v951_v17 = vpack.c.bf16 %v39_v16, %v38_v15 }
 0x10e   :  { %918 = vmatpush3.bf16.msra.mxu1 %v1085_v19  ;;  %v41_v19 = vld [vmem:[%s1262_s2 + $0x48] sm:$0xff] }
 0x10f   :  { %920 = vmatprep.subr.bf16.mxu1 %v1095_v22  ;;  %v954_v20 = vpack.c.bf16 %v41_v19, %v40_v18 }
 0x112   :  { %922 = vmatpush3.bf16.msra.mxu1 %v1095_v22  ;;  %v43_v22 = vld [vmem:[%s1262_s2 + $0x58] sm:$0xff] }
 0x113   :  { %924 = vmatprep.subr.bf16.mxu1 %v893_v25  ;;  %v957_v23 = vpack.c.bf16 %v43_v22, %v42_v21 }
 0x116   :  { %926 = vmatpush3.bf16.msra.mxu1 %v893_v25  ;;  %v45_v25 = vld [vmem:[%s1262_s2 + $0x68] sm:$0xff] }
 0x117   :  { %v960_v26 = vpack.c.bf16 %v45_v25, %v44_v24 }
 0x1cc   :  { %v769_v46 = vpop.f32.mrb[0].mxu1 }
 0x1cd   :  { %v258_v47 = vadd.f32 %v769_v46, %v161_v45  ;;  %v252_v48 = vpop.f32.mrb[1].mxu1  ;;  %v64_v46 = vld [vmem:[%s1263_s7] sm:$0x3] }
 0x1ce   :  { %v253_v49 = vadd.f32 %v252_v48, %v156_v43  ;;  %v47_v48 = vld [vmem:[%s1262_s2 + $0x78] sm:$0xff] }
 0x1cf   :  { %v272_v53 = vmax.f32 %v258_v47, 0.0  ;;  %v46_v47 = vld [vmem:[%s1262_s2 + $0x70] sm:$0xff] }
 0x1d0   :  { %v271_v51 = vmax.f32 %v253_v49, 0.0  ;;  %v772_v52 = vpop.f32.mrb[2].mxu1  ;;  %v963_v49 = vpack.c.bf16 %v47_v48, %v46_v47 }
 0x1d1   :  { %v268_v54 = vadd.f32 %v772_v52, %v171_v50  ;;  %v262_v55 = vpop.f32.mrb[3].mxu1  ;;  %v564_v52 = vrot.slane %v1143_v37, 1 }
 0x1d2   :  { %v263_v56 = vadd.f32 %v262_v55, %v166_v44  ;;  %805 = vmatprep.mubr.f32.mxu1 %v271_v51 }
 0x1d3   :  { %806 = vmatmul.mubr.f32.vlgmr.msra.gmra.mrb[4].mxu1 %v272_v53  ;;  %v274_v58 = vmax.f32 %v268_v54, 0.0 }
 0x1d4   :  { %v273_v57 = vmax.f32 %v263_v56, 0.0 }
 0x1d6   :  { %808 = vmatprep.mubr.f32.mxu1 %v273_v57  ;;  %v558_v57 = vpop.permute.xlu0 %557 }
 0x1d7   :  { %809 = vmatmul.mubr.f32.gmra.mrb[6].mxu1 %v274_v58 }
 0x1d8   :  { %819 = vmatprep.mubr.msk.f32.mxu1 %vm380_vm2, %v56_v59 }
 0x2a6   :  { %v807_v60 = vpop.f32.mrb[4].mxu1 }
 0x2a7   :  { %v341_v61 = vpop.f32.mrb[5].mxu1 }
 0x2a8   :  { %v927_v62 = vpack.c.bf16 %v807_v60, %v341_v61 }
 0x2aa   :  { %v810_v63 = vpop.f32.mrb[6].mxu1  ;;  %928 = vmatprep.subr.bf16.mxu1 %v927_v62 }
 0x2ab   :  { %v351_v1 = vpop.f32.mrb[7].mxu1  ;;  %930 = vmatpush3.bf16.msra.mxu1 %v927_v62 }
 0x2ac   :  { %v931_v2 = vpack.c.bf16 %v810_v63, %v351_v1 }
 0x2ae   :  { %932 = vmatprep.subr.bf16.mxu1 %v931_v2 }
 0x2af   :  { %934 = vmatpush3.bf16.msra.mxu1 %v931_v2 }
 0x2b0   :  { %935 = vmatprep.subr.bf16.mxu1 %v973_v0 }
 0x2b2   :  { %820 = vmatmul.mubr.msk.f32.vlgmr.msra.gmra.mrb[8].mxu1 %vm380_vm2, %v57_v3 }
 0x2b3   :  { %822 = vmatprep.mubr.msk.f32.mxu1 %vm380_vm2, %v58_v5 }
 0x2b6   :  { %823 = vmatmul.mubr.msk.f32.gmra.mrb[10].mxu1 %vm380_vm2, %v59_v6 }
 0x2b7   :  { %833 = vmatprep.mubr.msk.f32.mxu1 %vm974_vm0, %v975_v4  ;;  %v36_v4 = vld [vmem:[%s1262_s2 + $0x20] sm:$0xff] }
 0x2b8   :  { %v948_v14 = vpack.c.bf16 %v37_v13, %v36_v4 }
 0x2ba   :  { %949 = vmatpush3.bf16.msra.mxu0 %v948_v14 }
 0x2bb   :  { %950 = vmatprep.subr.bf16.mxu0 %v973_v0 }
 0x2be   :  { %952 = vmatpush3.bf16.msra.mxu0 %v951_v17 }
 0x2bf   :  { %953 = vmatprep.subr.bf16.mxu0 %v973_v0 }
 0x2c2   :  { %955 = vmatpush3.bf16.msra.mxu0 %v954_v20 }
 0x2c3   :  { %956 = vmatprep.subr.bf16.mxu0 %v973_v0 }
 0x2c6   :  { %958 = vmatpush3.bf16.msra.mxu0 %v957_v23 }
 0x2c7   :  { %959 = vmatprep.subr.bf16.mxu0 %v973_v0 }
 0x2ca   :  { %961 = vmatpush3.bf16.msra.mxu0 %v960_v26 }
 0x2cb   :  { %962 = vmatprep.subr.bf16.mxu0 %v973_v0 }
 0x2ce   :  { %964 = vmatpush3.bf16.msra.mxu0 %v963_v49 }
 0x385   :  { %v821_v29 = vpop.f32.mrb[8].mxu1 }
 0x386   :  { %v465_v30 = vadd.f32 %v821_v29, %v368_v27  ;;  %v459_v31 = vpop.f32.mrb[9].mxu1 }
 0x387   :  { %v460_v32 = vadd.f32 %v459_v31, %v363_v28 }
 0x388   :  { %v479_v33 = vmax.f32 %v465_v30, 0.0 }
 0x389   :  { %v478_v35 = vmax.f32 %v460_v32, 0.0  ;;  %v824_v36 = vpop.f32.mrb[10].mxu1 }
 0x38a   :  { %v475_v39 = vadd.f32 %v824_v36, %v378_v34  ;;  %v469_v40 = vpop.f32.mrb[11].mxu1 }
 0x38b   :  { %v936_v41 = vpack.c.bf16 %v479_v33, %v478_v35  ;;  %v470_v42 = vadd.f32 %v469_v40, %v373_v38 }
 0x38c   :  { %v481_v43 = vmax.f32 %v475_v39, 0.0 }
 0x38d   :  { %v480_v44 = vmax.f32 %v470_v42, 0.0  ;;  %937 = vmatpush3.bf16.msra.mxu1 %v936_v41 }
 0x38e   :  { %938 = vmatprep.subr.bf16.mxu1 %v973_v0 }
 0x38f   :  { %v939_v45 = vpack.c.bf16 %v481_v43, %v480_v44 }
 0x391   :  { %940 = vmatpush3.bf16.msra.mxu1 %v939_v45 }
 0x394   :  { %834 = vmatmul.mubr.msk.f32.vlgmr.msra.gmra.mrb[12].mxu1 %vm380_vm2, %v64_v46 }
 0x467   :  { %v551_v50 = vpop.f32.mrb[12].mxu1 }
 0x468   :  { %v562_v0 = vrot.slane %v551_v50, 1  ;;  %v835_v51 = vpop.f32.mrb[13].mxu1  ;;  %v560_v59 = vadd.f32 %v558_v57, %v551_v50 }
 0x46a   :  { %869 = vmatmul.mubr.f32.vlgmr.msra.gmra.mrb[2].mxu0 %v562_v0 }
 0x53d   :  { %v632_v53 = vpop.f32.mrb[2].mxu0 }
 0x53e   :  { %v633_v54 = vadd.f32 %v632_v53, %v564_v52  ;;  %v870_v55 = vpop.f32.mrb[3].mxu0 }
 0x540   :  { %971 = vtanh.f32 %v633_v54 }
 0x54a   :  { %v972_v56 = vpop.eup %971 }
 0x54b   :  { %v638_v58 = vsel %vm637_vm3, %v972_v56, 0.0 }
 0x54c   :  { %v640_v60 = vrot.slane %v638_v58, 7 }
 0x54e   :  { %v643_v61 = vsel %vm642_vm4, %v560_v59, %v640_v60 }
 0x54f   :  { %644 = vst [vmem:[%s1264_s9] sm:$0x3] %v643_v61 }

</bundles_post_ra>
